<compile_context>
chip_gen: v5e
topology: v5e:2x2
jax: 0.10.0
libtpu: 0.0.40
codegen_flags: <defaults>
</compile_context>

<pallas_src>
import functools
import math

import jax
import jax.numpy as jnp
from jax import lax
from jax.experimental import pallas as pl
from jax.experimental.pallas import tpu as pltpu


# ----------------------------------------------------------------------------- fused layer kernel
def _encoder_layer_kernel(x_ref, n1a_ref, n1b_ref, wqkv_ref, bqkv_ref,
                          wo_ref, bo_ref, n2a_ref, n2b_ref,
                          w1_ref, b1_ref, w2_ref, b2_ref, *rest,
                          eps, heads, d_k, d_model, apply_final_norm):
    if apply_final_norm:
        fa_ref, fb_ref, o_ref = rest
    else:
        (o_ref,) = rest

    def norm(v, a_ref, b_ref):
        mean = jnp.mean(v, axis=-1, keepdims=True)
        vc = v - mean
        var = jnp.sum(vc * vc, axis=-1, keepdims=True) * jnp.float32(1.0 / (d_model - 1))
        inv = pl.reciprocal(jnp.sqrt(var) + jnp.float32(eps), approx=True)   # EUP slot
        return a_ref[...].astype(jnp.float32) * (vc * inv) + b_ref[...].astype(jnp.float32)

    x = x_ref[0].astype(jnp.float32)                                         # (S, D)
    seq = x.shape[0]

    # ----- norm_1 -> fused QKV projection (single bf16 MXU matmul, f32 accumulate)
    x2 = norm(x, n1a_ref, n1b_ref)
    qkv = jnp.dot(x2.astype(jnp.bfloat16), wqkv_ref[...],
                  preferred_element_type=jnp.float32) + bqkv_ref[...].astype(jnp.float32)

    # ----- multi-head attention, heads handled in-register (no HBM transposes)
    scale = jnp.float32(1.0 / math.sqrt(d_k))
    attn = jnp.zeros((seq, d_model), jnp.float32)
    for h in range(heads):                                                   # static unroll
        lo = h * d_k
        qh = qkv[:, lo:lo + d_k].astype(jnp.bfloat16)
        kh = qkv[:, d_model + lo:d_model + lo + d_k].astype(jnp.bfloat16)
        vh = qkv[:, 2 * d_model + lo:2 * d_model + lo + d_k].astype(jnp.bfloat16)
        s = lax.dot_general(qh, kh, (((1,), (1,)), ((), ())),
                            preferred_element_type=jnp.float32) * scale       # (S, S)
        s = s - jnp.max(s, axis=-1, keepdims=True)
        e = jnp.exp(s)
        p = e * pl.reciprocal(jnp.sum(e, axis=-1, keepdims=True), approx=True)
        oh = jnp.dot(p.astype(jnp.bfloat16), vh, preferred_element_type=jnp.float32)
        # fold head h straight through its Wo row block (no lane concat needed)
        attn = attn + jnp.dot(oh.astype(jnp.bfloat16), wo_ref[h],
                              preferred_element_type=jnp.float32)
    x = x + attn + bo_ref[...].astype(jnp.float32)                           # residual (dropout = id)

    # ----- norm_2 -> feed-forward -> residual
    x2 = norm(x, n2a_ref, n2b_ref)
    h1 = jnp.dot(x2.astype(jnp.bfloat16), w1_ref[...],
                 preferred_element_type=jnp.float32) + b1_ref[...].astype(jnp.float32)
    h1 = jnp.maximum(h1, 0.0)
    x = x + jnp.dot(h1.astype(jnp.bfloat16), w2_ref[...],
                    preferred_element_type=jnp.float32) + b2_ref[...].astype(jnp.float32)

    if apply_final_norm:                                                     # final encoder Norm fused in
        x = norm(x, fa_ref, fb_ref)

    o_ref[0] = x.astype(o_ref.dtype)


# ----------------------------------------------------------------------------- wrappers
def _const_spec(shape):
    nd = len(shape)
    return pl.BlockSpec(shape, lambda b: (0,) * nd)        # constant block index -> stays resident


def _prepare_layer(p, heads, d_k):
    """Cast / pack weights once at the wrapper (bf16 MXU operands, f32 biases)."""
    d_model = p["wq"].shape[0]
    return dict(
        n1a=p["n1_a"].reshape(1, d_model), n1b=p["n1_b"].reshape(1, d_model),
        n2a=p["n2_a"].reshape(1, d_model), n2b=p["n2_b"].reshape(1, d_model),
        wqkv=jnp.concatenate([p["wq"], p["wk"], p["wv"]], axis=1).astype(jnp.bfloat16),
        bqkv=jnp.concatenate([p["bq"], p["bk"], p["bv"]]).reshape(1, 3 * d_model),
        wo=p["wo"].reshape(heads, d_k, d_model).astype(jnp.bfloat16),
        bo=p["bo"].reshape(1, d_model),
        w1=p["w1"].astype(jnp.bfloat16), b1=p["b1"].reshape(1, -1),
        w2=p["w2"].astype(jnp.bfloat16), b2=p["b2"].reshape(1, d_model),
    )


def _encoder_layer_call(x, lp, *, heads, d_k, eps, final_norm=None):
    bs, seq, d_model = x.shape
    hidden = lp["w1"].shape[1]

    args = [x, lp["n1a"], lp["n1b"], lp["wqkv"], lp["bqkv"], lp["wo"], lp["bo"],
            lp["n2a"], lp["n2b"], lp["w1"], lp["b1"], lp["w2"], lp["b2"]]
    in_specs = [pl.BlockSpec((1, seq, d_model), lambda b: (b, 0, 0))]
    in_specs += [_const_spec(a.shape) for a in args[1:]]
    if final_norm is not None:
        fa, fb = final_norm
        args += [fa, fb]
        in_specs += [_const_spec(fa.shape), _const_spec(fb.shape)]

    # VMEM budget from actual block footprints (x in + out double-buffered + resident weights),
    # capped below v7x's 64 MiB physical VMEM.
    blk_bytes = 4 * seq * d_model * x.dtype.itemsize
    blk_bytes += sum(a.size * a.dtype.itemsize for a in args[1:])
    vmem_limit = int(min(48 * 2**20, max(8 * 2**20, 8 * blk_bytes)))

    kernel = functools.partial(
        _encoder_layer_kernel, eps=eps, heads=heads, d_k=d_k, d_model=d_model,
        apply_final_norm=final_norm is not None)

    return pl.pallas_call(
        kernel,
        out_shape=jax.ShapeDtypeStruct((bs, seq, d_model), x.dtype),
        grid_spec=pltpu.PrefetchScalarGridSpec(
            num_scalar_prefetch=0,
            grid=(bs,),
            in_specs=in_specs,
            out_specs=pl.BlockSpec((1, seq, d_model), lambda b: (b, 0, 0)),
        ),
        compiler_params=pltpu.CompilerParams(
            dimension_semantics=("parallel",),
            vmem_limit_bytes=vmem_limit,
        ),
    )(*args)


def encoder_pallas(x, params, *, heads, d_k, eps=1e-6):
    """Full Encoder forward: N fused layer kernels; final Norm fused into the last layer."""
    layers = params["layers"]
    prepped = [_prepare_layer(p, heads, d_k) for p in layers]
    fnorm = (params["norm_a"].reshape(1, -1), params["norm_b"].reshape(1, -1))
    n_layers = len(layers)
    for i, lp in enumerate(prepped):
        x = _encoder_layer_call(
            x, lp, heads=heads, d_k=d_k, eps=eps,
            final_norm=fnorm if i == n_layers - 1 else None)
    return x


# ----------------------------------------------------------------------------- Pure-JAX reference
def _norm_ref(x, a, b, eps=1e-6):
    mean = jnp.mean(x, -1, keepdims=True)
    xc = x - mean
    std = jnp.sqrt(jnp.sum(xc * xc, -1, keepdims=True) / (x.shape[-1] - 1))
    return a * xc / (std + eps) + b


def encoder_ref(x, params, heads, d_k):
    bs, seq, dm = x.shape
    for p in params["layers"]:
        x2 = _norm_ref(x, p["n1_a"], p["n1_b"])
        q = x2 @ p["wq"] + p["bq"]
        k = x2 @ p["wk"] + p["bk"]
        v = x2 @ p["wv"] + p["bv"]

        def split(t):
            return t.reshape(bs, seq, heads, d_k).transpose(0, 2, 1, 3)

        qh, kh, vh = split(q), split(k), split(v)
        s = qh @ kh.transpose(0, 1, 3, 2) / math.sqrt(d_k)
        pr = jax.nn.softmax(s, axis=-1)
        att = (pr @ vh).transpose(0, 2, 1, 3).reshape(bs, seq, dm)
        x = x + (att @ p["wo"] + p["bo"])
        x2 = _norm_ref(x, p["n2_a"], p["n2_b"])
        h = jnp.maximum(x2 @ p["w1"] + p["b1"], 0.0)
        x = x + (h @ p["w2"] + p["b2"])
    return _norm_ref(x, params["norm_a"], params["norm_b"])


# ----------------------------------------------------------------------------- params / demo
def init_params(key, d_model, n_layers, hidden):
    def dense(k, fan_in, fan_out):
        kw, kb = jax.random.split(k)
        lim = 1.0 / math.sqrt(fan_in)
        w = jax.random.uniform(kw, (fan_in, fan_out), jnp.float32, -lim, lim)
        b = jax.random.uniform(kb, (fan_out,), jnp.float32, -lim, lim)
        return w, b

    keys = jax.random.split(key, n_layers)
    layers = []
    for i in range(n_layers):
        ks = jax.random.split(keys[i], 6)
        wq, bq = dense(ks[0], d_model, d_model)
        wk, bk = dense(ks[1], d_model, d_model)
        wv, bv = dense(ks[2], d_model, d_model)
        wo, bo = dense(ks[3], d_model, d_model)
        w1, b1 = dense(ks[4], d_model, hidden)
        w2, b2 = dense(ks[5], hidden, d_model)
        layers.append(dict(
            n1_a=jnp.ones((d_model,), jnp.float32), n1_b=jnp.zeros((d_model,), jnp.float32),
            n2_a=jnp.ones((d_model,), jnp.float32), n2_b=jnp.zeros((d_model,), jnp.float32),
            wq=wq, bq=bq, wk=wk, bk=bk, wv=wv, bv=bv, wo=wo, bo=bo,
            w1=w1, b1=b1, w2=w2, b2=b2))
    return dict(layers=layers,
                norm_a=jnp.ones((d_model,), jnp.float32),
                norm_b=jnp.zeros((d_model,), jnp.float32))


if __name__ == "__main__":
    d_model, heads, n_layers, hidden = 32, 4, 2, 64
    batch, seq = 2, 8
    d_k = d_model // heads

    key = jax.random.PRNGKey(0)
    kx, kp = jax.random.split(key)
    x = jax.random.normal(kx, (batch, seq, d_model), dtype=jnp.float32)
    params = init_params(kp, d_model, n_layers, hidden)

    out = encoder_pallas(x, params, heads=heads, d_k=d_k)
    out = jax.block_until_ready(out)

    ref = encoder_ref(x, params, heads, d_k)
    err = float(jnp.max(jnp.abs(out - ref)))
    assert err < 1e-1, f"mismatch vs reference: max abs err {err}"
    print("KERNEL_OK")
</pallas_src>

<mosaic_0001>
module attributes {stable_mosaic.version = 11 : i64} {
  func.func @_encoder_layer_kernel(%arg0: i32, %arg1: memref<1x8x32xf32, #tpu.memory_space<vmem>>, %arg2: memref<1x32xf32, #tpu.memory_space<vmem>>, %arg3: memref<1x32xf32, #tpu.memory_space<vmem>>, %arg4: memref<32x96xbf16, #tpu.memory_space<vmem>>, %arg5: memref<1x96xf32, #tpu.memory_space<vmem>>, %arg6: memref<4x8x32xbf16, #tpu.memory_space<vmem>>, %arg7: memref<1x32xf32, #tpu.memory_space<vmem>>, %arg8: memref<1x32xf32, #tpu.memory_space<vmem>>, %arg9: memref<1x32xf32, #tpu.memory_space<vmem>>, %arg10: memref<32x64xbf16, #tpu.memory_space<vmem>>, %arg11: memref<1x64xf32, #tpu.memory_space<vmem>>, %arg12: memref<64x32xbf16, #tpu.memory_space<vmem>>, %arg13: memref<1x32xf32, #tpu.memory_space<vmem>>, %arg14: memref<1x8x32xf32, #tpu.memory_space<vmem>>) attributes {dimension_semantics = [#tpu.dimension_semantics<parallel>], iteration_bounds = array<i64: 2>, scalar_prefetch = 0 : i64, scratch_operands = 0 : i64, tpu.core_type = #tpu.core_type<tc>, window_params = [{transform_indices = @transform_0, window_bounds = array<i64: 1, 8, 32>}, {pipeline_mode = #tpu.pipeline_mode<synchronous>, transform_indices = @transform_1, window_bounds = array<i64: 1, 32>}, {pipeline_mode = #tpu.pipeline_mode<synchronous>, transform_indices = @transform_2, window_bounds = array<i64: 1, 32>}, {pipeline_mode = #tpu.pipeline_mode<synchronous>, transform_indices = @transform_3, window_bounds = array<i64: 32, 96>}, {pipeline_mode = #tpu.pipeline_mode<synchronous>, transform_indices = @transform_4, window_bounds = array<i64: 1, 96>}, {pipeline_mode = #tpu.pipeline_mode<synchronous>, transform_indices = @transform_5, window_bounds = array<i64: 4, 8, 32>}, {pipeline_mode = #tpu.pipeline_mode<synchronous>, transform_indices = @transform_6, window_bounds = array<i64: 1, 32>}, {pipeline_mode = #tpu.pipeline_mode<synchronous>, transform_indices = @transform_7, window_bounds = array<i64: 1, 32>}, {pipeline_mode = #tpu.pipeline_mode<synchronous>, transform_indices = @transform_8, window_bounds = array<i64: 1, 32>}, {pipeline_mode = #tpu.pipeline_mode<synchronous>, transform_indices = @transform_9, window_bounds = array<i64: 32, 64>}, {pipeline_mode = #tpu.pipeline_mode<synchronous>, transform_indices = @transform_10, window_bounds = array<i64: 1, 64>}, {pipeline_mode = #tpu.pipeline_mode<synchronous>, transform_indices = @transform_11, window_bounds = array<i64: 64, 32>}, {pipeline_mode = #tpu.pipeline_mode<synchronous>, transform_indices = @transform_12, window_bounds = array<i64: 1, 32>}, {transform_indices = @transform_13, window_bounds = array<i64: 1, 8, 32>}]} {
    %c0 = arith.constant 0 : index
    %c0_0 = arith.constant 0 : index
    %c0_1 = arith.constant 0 : index
    %0 = vector.load %arg1[%c0, %c0_0, %c0_1] : memref<1x8x32xf32, #tpu.memory_space<vmem>>, vector<1x8x32xf32>
    %1 = vector.shape_cast %0 : vector<1x8x32xf32> to vector<8x32xf32>
    %cst = arith.constant dense<0.000000e+00> : vector<8xf32>
    %2 = vector.multi_reduction <add>, %1, %cst [1] : vector<8x32xf32> to vector<8xf32>
    %3 = vector.shape_cast %2 : vector<8xf32> to vector<8x1xf32>
    %cst_2 = arith.constant 3.200000e+01 : f32
    %4 = vector.broadcast %cst_2 : f32 to vector<8x1xf32>
    %5 = arith.divf %3, %4 : vector<8x1xf32>
    %6 = vector.broadcast %5 : vector<8x1xf32> to vector<8x32xf32>
    %7 = arith.subf %1, %6 : vector<8x32xf32>
    %8 = arith.mulf %7, %7 : vector<8x32xf32>
    %cst_3 = arith.constant dense<0.000000e+00> : vector<8xf32>
    %9 = vector.multi_reduction <add>, %8, %cst_3 [1] : vector<8x32xf32> to vector<8xf32>
    %10 = vector.shape_cast %9 : vector<8xf32> to vector<8x1xf32>
    %cst_4 = arith.constant 0.0322580636 : f32
    %11 = vector.broadcast %cst_4 : f32 to vector<8x1xf32>
    %12 = arith.mulf %10, %11 : vector<8x1xf32>
    %13 = math.sqrt %12 : vector<8x1xf32>
    %cst_5 = arith.constant 9.99999997E-7 : f32
    %14 = vector.broadcast %cst_5 : f32 to vector<8x1xf32>
    %15 = arith.addf %13, %14 : vector<8x1xf32>
    %16 = tpu.reciprocal %15 {approx = true} : vector<8x1xf32> -> vector<8x1xf32>
    %c0_6 = arith.constant 0 : index
    %c0_7 = arith.constant 0 : index
    %17 = vector.load %arg2[%c0_6, %c0_7] : memref<1x32xf32, #tpu.memory_space<vmem>>, vector<1x32xf32>
    %18 = vector.broadcast %16 : vector<8x1xf32> to vector<8x32xf32>
    %19 = arith.mulf %7, %18 : vector<8x32xf32>
    %20 = vector.broadcast %17 : vector<1x32xf32> to vector<8x32xf32>
    %21 = arith.mulf %20, %19 : vector<8x32xf32>
    %c0_8 = arith.constant 0 : index
    %c0_9 = arith.constant 0 : index
    %22 = vector.load %arg3[%c0_8, %c0_9] : memref<1x32xf32, #tpu.memory_space<vmem>>, vector<1x32xf32>
    %23 = vector.broadcast %22 : vector<1x32xf32> to vector<8x32xf32>
    %24 = arith.addf %21, %23 : vector<8x32xf32>
    %25 = arith.truncf %24 : vector<8x32xf32> to vector<8x32xbf16>
    %c0_10 = arith.constant 0 : index
    %c0_11 = arith.constant 0 : index
    %26 = vector.load %arg4[%c0_10, %c0_11] : memref<32x96xbf16, #tpu.memory_space<vmem>>, vector<32x96xbf16>
    %cst_12 = arith.constant dense<0.000000e+00> : vector<8x96xf32>
    %27 = tpu.matmul %25, %26, %cst_12 {dimension_numbers = #tpu.dot_dimension_numbers<[1], [0], [0], [1], [0, 0, 1, 1], [], []>} : vector<8x32xbf16>, vector<32x96xbf16>, vector<8x96xf32> -> vector<8x96xf32>
    %c0_13 = arith.constant 0 : index
    %c0_14 = arith.constant 0 : index
    %28 = vector.load %arg5[%c0_13, %c0_14] : memref<1x96xf32, #tpu.memory_space<vmem>>, vector<1x96xf32>
    %29 = vector.broadcast %28 : vector<1x96xf32> to vector<8x96xf32>
    %30 = arith.addf %27, %29 : vector<8x96xf32>
    %cst_15 = arith.constant 0.000000e+00 : f32
    %31 = vector.broadcast %cst_15 : f32 to vector<8x32xf32>
    %32 = vector.extract_strided_slice %30 {offsets = [0, 0], sizes = [8, 8], strides = [1, 1]} : vector<8x96xf32> to vector<8x8xf32>
    %33 = arith.truncf %32 : vector<8x8xf32> to vector<8x8xbf16>
    %34 = vector.extract_strided_slice %30 {offsets = [0, 32], sizes = [8, 8], strides = [1, 1]} : vector<8x96xf32> to vector<8x8xf32>
    %35 = arith.truncf %34 : vector<8x8xf32> to vector<8x8xbf16>
    %36 = vector.extract_strided_slice %30 {offsets = [0, 64], sizes = [8, 8], strides = [1, 1]} : vector<8x96xf32> to vector<8x8xf32>
    %37 = arith.truncf %36 : vector<8x8xf32> to vector<8x8xbf16>
    %cst_16 = arith.constant dense<0.000000e+00> : vector<8x8xf32>
    %38 = tpu.matmul %33, %35, %cst_16 {dimension_numbers = #tpu.dot_dimension_numbers<[1], [1], [0], [0], [0, 0, 1, 0], [], []>} : vector<8x8xbf16>, vector<8x8xbf16>, vector<8x8xf32> -> vector<8x8xf32>
    %cst_17 = arith.constant 0.353553385 : f32
    %39 = vector.broadcast %cst_17 : f32 to vector<8x8xf32>
    %40 = arith.mulf %38, %39 : vector<8x8xf32>
    %cst_18 = arith.constant dense<0xFF800000> : vector<8xf32>
    %41 = vector.multi_reduction <maximumf>, %40, %cst_18 [1] : vector<8x8xf32> to vector<8xf32>
    %42 = vector.shape_cast %41 : vector<8xf32> to vector<8x1xf32>
    %43 = vector.broadcast %42 : vector<8x1xf32> to vector<8x8xf32>
    %44 = arith.subf %40, %43 : vector<8x8xf32>
    %45 = math.exp %44 : vector<8x8xf32>
    %cst_19 = arith.constant dense<0.000000e+00> : vector<8xf32>
    %46 = vector.multi_reduction <add>, %45, %cst_19 [1] : vector<8x8xf32> to vector<8xf32>
    %47 = vector.shape_cast %46 : vector<8xf32> to vector<8x1xf32>
    %48 = tpu.reciprocal %47 {approx = true} : vector<8x1xf32> -> vector<8x1xf32>
    %49 = vector.broadcast %48 : vector<8x1xf32> to vector<8x8xf32>
    %50 = arith.mulf %45, %49 : vector<8x8xf32>
    %51 = arith.truncf %50 : vector<8x8xf32> to vector<8x8xbf16>
    %cst_20 = arith.constant dense<0.000000e+00> : vector<8x8xf32>
    %52 = tpu.matmul %51, %37, %cst_20 {dimension_numbers = #tpu.dot_dimension_numbers<[1], [0], [0], [1], [0, 0, 1, 1], [], []>} : vector<8x8xbf16>, vector<8x8xbf16>, vector<8x8xf32> -> vector<8x8xf32>
    %53 = arith.truncf %52 : vector<8x8xf32> to vector<8x8xbf16>
    %c0_21 = arith.constant 0 : index
    %c0_22 = arith.constant 0 : index
    %c0_23 = arith.constant 0 : index
    %54 = vector.load %arg6[%c0_21, %c0_22, %c0_23] : memref<4x8x32xbf16, #tpu.memory_space<vmem>>, vector<1x8x32xbf16>
    %55 = vector.shape_cast %54 : vector<1x8x32xbf16> to vector<8x32xbf16>
    %cst_24 = arith.constant dense<0.000000e+00> : vector<8x32xf32>
    %56 = tpu.matmul %53, %55, %cst_24 {dimension_numbers = #tpu.dot_dimension_numbers<[1], [0], [0], [1], [0, 0, 1, 1], [], []>} : vector<8x8xbf16>, vector<8x32xbf16>, vector<8x32xf32> -> vector<8x32xf32>
    %57 = arith.addf %31, %56 : vector<8x32xf32>
    %58 = vector.extract_strided_slice %30 {offsets = [0, 8], sizes = [8, 8], strides = [1, 1]} : vector<8x96xf32> to vector<8x8xf32>
    %59 = arith.truncf %58 : vector<8x8xf32> to vector<8x8xbf16>
    %60 = vector.extract_strided_slice %30 {offsets = [0, 40], sizes = [8, 8], strides = [1, 1]} : vector<8x96xf32> to vector<8x8xf32>
    %61 = arith.truncf %60 : vector<8x8xf32> to vector<8x8xbf16>
    %62 = vector.extract_strided_slice %30 {offsets = [0, 72], sizes = [8, 8], strides = [1, 1]} : vector<8x96xf32> to vector<8x8xf32>
    %63 = arith.truncf %62 : vector<8x8xf32> to vector<8x8xbf16>
    %cst_25 = arith.constant dense<0.000000e+00> : vector<8x8xf32>
    %64 = tpu.matmul %59, %61, %cst_25 {dimension_numbers = #tpu.dot_dimension_numbers<[1], [1], [0], [0], [0, 0, 1, 0], [], []>} : vector<8x8xbf16>, vector<8x8xbf16>, vector<8x8xf32> -> vector<8x8xf32>
    %cst_26 = arith.constant 0.353553385 : f32
    %65 = vector.broadcast %cst_26 : f32 to vector<8x8xf32>
    %66 = arith.mulf %64, %65 : vector<8x8xf32>
    %cst_27 = arith.constant dense<0xFF800000> : vector<8xf32>
    %67 = vector.multi_reduction <maximumf>, %66, %cst_27 [1] : vector<8x8xf32> to vector<8xf32>
    %68 = vector.shape_cast %67 : vector<8xf32> to vector<8x1xf32>
    %69 = vector.broadcast %68 : vector<8x1xf32> to vector<8x8xf32>
    %70 = arith.subf %66, %69 : vector<8x8xf32>
    %71 = math.exp %70 : vector<8x8xf32>
    %cst_28 = arith.constant dense<0.000000e+00> : vector<8xf32>
    %72 = vector.multi_reduction <add>, %71, %cst_28 [1] : vector<8x8xf32> to vector<8xf32>
    %73 = vector.shape_cast %72 : vector<8xf32> to vector<8x1xf32>
    %74 = tpu.reciprocal %73 {approx = true} : vector<8x1xf32> -> vector<8x1xf32>
    %75 = vector.broadcast %74 : vector<8x1xf32> to vector<8x8xf32>
    %76 = arith.mulf %71, %75 : vector<8x8xf32>
    %77 = arith.truncf %76 : vector<8x8xf32> to vector<8x8xbf16>
    %cst_29 = arith.constant dense<0.000000e+00> : vector<8x8xf32>
    %78 = tpu.matmul %77, %63, %cst_29 {dimension_numbers = #tpu.dot_dimension_numbers<[1], [0], [0], [1], [0, 0, 1, 1], [], []>} : vector<8x8xbf16>, vector<8x8xbf16>, vector<8x8xf32> -> vector<8x8xf32>
    %79 = arith.truncf %78 : vector<8x8xf32> to vector<8x8xbf16>
    %c1 = arith.constant 1 : index
    %c0_30 = arith.constant 0 : index
    %c0_31 = arith.constant 0 : index
    %80 = vector.load %arg6[%c1, %c0_30, %c0_31] : memref<4x8x32xbf16, #tpu.memory_space<vmem>>, vector<1x8x32xbf16>
    %81 = vector.shape_cast %80 : vector<1x8x32xbf16> to vector<8x32xbf16>
    %cst_32 = arith.constant dense<0.000000e+00> : vector<8x32xf32>
    %82 = tpu.matmul %79, %81, %cst_32 {dimension_numbers = #tpu.dot_dimension_numbers<[1], [0], [0], [1], [0, 0, 1, 1], [], []>} : vector<8x8xbf16>, vector<8x32xbf16>, vector<8x32xf32> -> vector<8x32xf32>
    %83 = arith.addf %57, %82 : vector<8x32xf32>
    %84 = vector.extract_strided_slice %30 {offsets = [0, 16], sizes = [8, 8], strides = [1, 1]} : vector<8x96xf32> to vector<8x8xf32>
    %85 = arith.truncf %84 : vector<8x8xf32> to vector<8x8xbf16>
    %86 = vector.extract_strided_slice %30 {offsets = [0, 48], sizes = [8, 8], strides = [1, 1]} : vector<8x96xf32> to vector<8x8xf32>
    %87 = arith.truncf %86 : vector<8x8xf32> to vector<8x8xbf16>
    %88 = vector.extract_strided_slice %30 {offsets = [0, 80], sizes = [8, 8], strides = [1, 1]} : vector<8x96xf32> to vector<8x8xf32>
    %89 = arith.truncf %88 : vector<8x8xf32> to vector<8x8xbf16>
    %cst_33 = arith.constant dense<0.000000e+00> : vector<8x8xf32>
    %90 = tpu.matmul %85, %87, %cst_33 {dimension_numbers = #tpu.dot_dimension_numbers<[1], [1], [0], [0], [0, 0, 1, 0], [], []>} : vector<8x8xbf16>, vector<8x8xbf16>, vector<8x8xf32> -> vector<8x8xf32>
    %cst_34 = arith.constant 0.353553385 : f32
    %91 = vector.broadcast %cst_34 : f32 to vector<8x8xf32>
    %92 = arith.mulf %90, %91 : vector<8x8xf32>
    %cst_35 = arith.constant dense<0xFF800000> : vector<8xf32>
    %93 = vector.multi_reduction <maximumf>, %92, %cst_35 [1] : vector<8x8xf32> to vector<8xf32>
    %94 = vector.shape_cast %93 : vector<8xf32> to vector<8x1xf32>
    %95 = vector.broadcast %94 : vector<8x1xf32> to vector<8x8xf32>
    %96 = arith.subf %92, %95 : vector<8x8xf32>
    %97 = math.exp %96 : vector<8x8xf32>
    %cst_36 = arith.constant dense<0.000000e+00> : vector<8xf32>
    %98 = vector.multi_reduction <add>, %97, %cst_36 [1] : vector<8x8xf32> to vector<8xf32>
    %99 = vector.shape_cast %98 : vector<8xf32> to vector<8x1xf32>
    %100 = tpu.reciprocal %99 {approx = true} : vector<8x1xf32> -> vector<8x1xf32>
    %101 = vector.broadcast %100 : vector<8x1xf32> to vector<8x8xf32>
    %102 = arith.mulf %97, %101 : vector<8x8xf32>
    %103 = arith.truncf %102 : vector<8x8xf32> to vector<8x8xbf16>
    %cst_37 = arith.constant dense<0.000000e+00> : vector<8x8xf32>
    %104 = tpu.matmul %103, %89, %cst_37 {dimension_numbers = #tpu.dot_dimension_numbers<[1], [0], [0], [1], [0, 0, 1, 1], [], []>} : vector<8x8xbf16>, vector<8x8xbf16>, vector<8x8xf32> -> vector<8x8xf32>
    %105 = arith.truncf %104 : vector<8x8xf32> to vector<8x8xbf16>
    %c2 = arith.constant 2 : index
    %c0_38 = arith.constant 0 : index
    %c0_39 = arith.constant 0 : index
    %106 = vector.load %arg6[%c2, %c0_38, %c0_39] : memref<4x8x32xbf16, #tpu.memory_space<vmem>>, vector<1x8x32xbf16>
    %107 = vector.shape_cast %106 : vector<1x8x32xbf16> to vector<8x32xbf16>
    %cst_40 = arith.constant dense<0.000000e+00> : vector<8x32xf32>
    %108 = tpu.matmul %105, %107, %cst_40 {dimension_numbers = #tpu.dot_dimension_numbers<[1], [0], [0], [1], [0, 0, 1, 1], [], []>} : vector<8x8xbf16>, vector<8x32xbf16>, vector<8x32xf32> -> vector<8x32xf32>
    %109 = arith.addf %83, %108 : vector<8x32xf32>
    %110 = vector.extract_strided_slice %30 {offsets = [0, 24], sizes = [8, 8], strides = [1, 1]} : vector<8x96xf32> to vector<8x8xf32>
    %111 = arith.truncf %110 : vector<8x8xf32> to vector<8x8xbf16>
    %112 = vector.extract_strided_slice %30 {offsets = [0, 56], sizes = [8, 8], strides = [1, 1]} : vector<8x96xf32> to vector<8x8xf32>
    %113 = arith.truncf %112 : vector<8x8xf32> to vector<8x8xbf16>
    %114 = vector.extract_strided_slice %30 {offsets = [0, 88], sizes = [8, 8], strides = [1, 1]} : vector<8x96xf32> to vector<8x8xf32>
    %115 = arith.truncf %114 : vector<8x8xf32> to vector<8x8xbf16>
    %cst_41 = arith.constant dense<0.000000e+00> : vector<8x8xf32>
    %116 = tpu.matmul %111, %113, %cst_41 {dimension_numbers = #tpu.dot_dimension_numbers<[1], [1], [0], [0], [0, 0, 1, 0], [], []>} : vector<8x8xbf16>, vector<8x8xbf16>, vector<8x8xf32> -> vector<8x8xf32>
    %cst_42 = arith.constant 0.353553385 : f32
    %117 = vector.broadcast %cst_42 : f32 to vector<8x8xf32>
    %118 = arith.mulf %116, %117 : vector<8x8xf32>
    %cst_43 = arith.constant dense<0xFF800000> : vector<8xf32>
    %119 = vector.multi_reduction <maximumf>, %118, %cst_43 [1] : vector<8x8xf32> to vector<8xf32>
    %120 = vector.shape_cast %119 : vector<8xf32> to vector<8x1xf32>
    %121 = vector.broadcast %120 : vector<8x1xf32> to vector<8x8xf32>
    %122 = arith.subf %118, %121 : vector<8x8xf32>
    %123 = math.exp %122 : vector<8x8xf32>
    %cst_44 = arith.constant dense<0.000000e+00> : vector<8xf32>
    %124 = vector.multi_reduction <add>, %123, %cst_44 [1] : vector<8x8xf32> to vector<8xf32>
    %125 = vector.shape_cast %124 : vector<8xf32> to vector<8x1xf32>
    %126 = tpu.reciprocal %125 {approx = true} : vector<8x1xf32> -> vector<8x1xf32>
    %127 = vector.broadcast %126 : vector<8x1xf32> to vector<8x8xf32>
    %128 = arith.mulf %123, %127 : vector<8x8xf32>
    %129 = arith.truncf %128 : vector<8x8xf32> to vector<8x8xbf16>
    %cst_45 = arith.constant dense<0.000000e+00> : vector<8x8xf32>
    %130 = tpu.matmul %129, %115, %cst_45 {dimension_numbers = #tpu.dot_dimension_numbers<[1], [0], [0], [1], [0, 0, 1, 1], [], []>} : vector<8x8xbf16>, vector<8x8xbf16>, vector<8x8xf32> -> vector<8x8xf32>
    %131 = arith.truncf %130 : vector<8x8xf32> to vector<8x8xbf16>
    %c3 = arith.constant 3 : index
    %c0_46 = arith.constant 0 : index
    %c0_47 = arith.constant 0 : index
    %132 = vector.load %arg6[%c3, %c0_46, %c0_47] : memref<4x8x32xbf16, #tpu.memory_space<vmem>>, vector<1x8x32xbf16>
    %133 = vector.shape_cast %132 : vector<1x8x32xbf16> to vector<8x32xbf16>
    %cst_48 = arith.constant dense<0.000000e+00> : vector<8x32xf32>
    %134 = tpu.matmul %131, %133, %cst_48 {dimension_numbers = #tpu.dot_dimension_numbers<[1], [0], [0], [1], [0, 0, 1, 1], [], []>} : vector<8x8xbf16>, vector<8x32xbf16>, vector<8x32xf32> -> vector<8x32xf32>
    %135 = arith.addf %109, %134 : vector<8x32xf32>
    %136 = arith.addf %1, %135 : vector<8x32xf32>
    %c0_49 = arith.constant 0 : index
    %c0_50 = arith.constant 0 : index
    %137 = vector.load %arg7[%c0_49, %c0_50] : memref<1x32xf32, #tpu.memory_space<vmem>>, vector<1x32xf32>
    %138 = vector.broadcast %137 : vector<1x32xf32> to vector<8x32xf32>
    %139 = arith.addf %136, %138 : vector<8x32xf32>
    %cst_51 = arith.constant dense<0.000000e+00> : vector<8xf32>
    %140 = vector.multi_reduction <add>, %139, %cst_51 [1] : vector<8x32xf32> to vector<8xf32>
    %141 = vector.shape_cast %140 : vector<8xf32> to vector<8x1xf32>
    %cst_52 = arith.constant 3.200000e+01 : f32
    %142 = vector.broadcast %cst_52 : f32 to vector<8x1xf32>
    %143 = arith.divf %141, %142 : vector<8x1xf32>
    %144 = vector.broadcast %143 : vector<8x1xf32> to vector<8x32xf32>
    %145 = arith.subf %139, %144 : vector<8x32xf32>
    %146 = arith.mulf %145, %145 : vector<8x32xf32>
    %cst_53 = arith.constant dense<0.000000e+00> : vector<8xf32>
    %147 = vector.multi_reduction <add>, %146, %cst_53 [1] : vector<8x32xf32> to vector<8xf32>
    %148 = vector.shape_cast %147 : vector<8xf32> to vector<8x1xf32>
    %cst_54 = arith.constant 0.0322580636 : f32
    %149 = vector.broadcast %cst_54 : f32 to vector<8x1xf32>
    %150 = arith.mulf %148, %149 : vector<8x1xf32>
    %151 = math.sqrt %150 : vector<8x1xf32>
    %cst_55 = arith.constant 9.99999997E-7 : f32
    %152 = vector.broadcast %cst_55 : f32 to vector<8x1xf32>
    %153 = arith.addf %151, %152 : vector<8x1xf32>
    %154 = tpu.reciprocal %153 {approx = true} : vector<8x1xf32> -> vector<8x1xf32>
    %c0_56 = arith.constant 0 : index
    %c0_57 = arith.constant 0 : index
    %155 = vector.load %arg8[%c0_56, %c0_57] : memref<1x32xf32, #tpu.memory_space<vmem>>, vector<1x32xf32>
    %156 = vector.broadcast %154 : vector<8x1xf32> to vector<8x32xf32>
    %157 = arith.mulf %145, %156 : vector<8x32xf32>
    %158 = vector.broadcast %155 : vector<1x32xf32> to vector<8x32xf32>
    %159 = arith.mulf %158, %157 : vector<8x32xf32>
    %c0_58 = arith.constant 0 : index
    %c0_59 = arith.constant 0 : index
    %160 = vector.load %arg9[%c0_58, %c0_59] : memref<1x32xf32, #tpu.memory_space<vmem>>, vector<1x32xf32>
    %161 = vector.broadcast %160 : vector<1x32xf32> to vector<8x32xf32>
    %162 = arith.addf %159, %161 : vector<8x32xf32>
    %163 = arith.truncf %162 : vector<8x32xf32> to vector<8x32xbf16>
    %c0_60 = arith.constant 0 : index
    %c0_61 = arith.constant 0 : index
    %164 = vector.load %arg10[%c0_60, %c0_61] : memref<32x64xbf16, #tpu.memory_space<vmem>>, vector<32x64xbf16>
    %cst_62 = arith.constant dense<0.000000e+00> : vector<8x64xf32>
    %165 = tpu.matmul %163, %164, %cst_62 {dimension_numbers = #tpu.dot_dimension_numbers<[1], [0], [0], [1], [0, 0, 1, 1], [], []>} : vector<8x32xbf16>, vector<32x64xbf16>, vector<8x64xf32> -> vector<8x64xf32>
    %c0_63 = arith.constant 0 : index
    %c0_64 = arith.constant 0 : index
    %166 = vector.load %arg11[%c0_63, %c0_64] : memref<1x64xf32, #tpu.memory_space<vmem>>, vector<1x64xf32>
    %167 = vector.broadcast %166 : vector<1x64xf32> to vector<8x64xf32>
    %168 = arith.addf %165, %167 : vector<8x64xf32>
    %cst_65 = arith.constant 0.000000e+00 : f32
    %169 = vector.broadcast %cst_65 : f32 to vector<8x64xf32>
    %170 = arith.maximumf %168, %169 : vector<8x64xf32>
    %171 = arith.truncf %170 : vector<8x64xf32> to vector<8x64xbf16>
    %c0_66 = arith.constant 0 : index
    %c0_67 = arith.constant 0 : index
    %172 = vector.load %arg12[%c0_66, %c0_67] : memref<64x32xbf16, #tpu.memory_space<vmem>>, vector<64x32xbf16>
    %cst_68 = arith.constant dense<0.000000e+00> : vector<8x32xf32>
    %173 = tpu.matmul %171, %172, %cst_68 {dimension_numbers = #tpu.dot_dimension_numbers<[1], [0], [0], [1], [0, 0, 1, 1], [], []>} : vector<8x64xbf16>, vector<64x32xbf16>, vector<8x32xf32> -> vector<8x32xf32>
    %174 = arith.addf %139, %173 : vector<8x32xf32>
    %c0_69 = arith.constant 0 : index
    %c0_70 = arith.constant 0 : index
    %175 = vector.load %arg13[%c0_69, %c0_70] : memref<1x32xf32, #tpu.memory_space<vmem>>, vector<1x32xf32>
    %176 = vector.broadcast %175 : vector<1x32xf32> to vector<8x32xf32>
    %177 = arith.addf %174, %176 : vector<8x32xf32>
    %c0_71 = arith.constant 0 : index
    %c0_72 = arith.constant 0 : index
    %c0_73 = arith.constant 0 : index
    %178 = vector.load %arg14[%c0_71, %c0_72, %c0_73] : memref<1x8x32xf32, #tpu.memory_space<vmem>>, vector<1x8x32xf32>
    %179 = vector.shape_cast %178 : vector<1x8x32xf32> to vector<8x32xf32>
    %180 = vector.shape_cast %177 : vector<8x32xf32> to vector<1x8x32xf32>
    tpu.vector_store %arg14[%c0_71, %c0_72, %c0_73], %180 {strides = array<i32>} : memref<1x8x32xf32, #tpu.memory_space<vmem>>, vector<1x8x32xf32>,
    return
  }
  func.func @transform_0(%arg0: i32) -> (i32, i32, i32) {
    %c0_i32 = arith.constant 0 : i32
    %c0_i32_0 = arith.constant 0 : i32
    %c0_i32_1 = arith.constant 0 : i32
    return %arg0, %c0_i32, %c0_i32_0 : i32, i32, i32
  }
  func.func @transform_1(%arg0: i32) -> (i32, i32) {
    %c0_i32 = arith.constant 0 : i32
    %c0_i32_0 = arith.constant 0 : i32
    %c0_i32_1 = arith.constant 0 : i32
    return %c0_i32, %c0_i32_0 : i32, i32
  }
  func.func @transform_2(%arg0: i32) -> (i32, i32) {
    %c0_i32 = arith.constant 0 : i32
    %c0_i32_0 = arith.constant 0 : i32
    %c0_i32_1 = arith.constant 0 : i32
    return %c0_i32, %c0_i32_0 : i32, i32
  }
  func.func @transform_3(%arg0: i32) -> (i32, i32) {
    %c0_i32 = arith.constant 0 : i32
    %c0_i32_0 = arith.constant 0 : i32
    %c0_i32_1 = arith.constant 0 : i32
    return %c0_i32, %c0_i32_0 : i32, i32
  }
  func.func @transform_4(%arg0: i32) -> (i32, i32) {
    %c0_i32 = arith.constant 0 : i32
    %c0_i32_0 = arith.constant 0 : i32
    %c0_i32_1 = arith.constant 0 : i32
    return %c0_i32, %c0_i32_0 : i32, i32
  }
  func.func @transform_5(%arg0: i32) -> (i32, i32, i32) {
    %c0_i32 = arith.constant 0 : i32
    %c0_i32_0 = arith.constant 0 : i32
    %c0_i32_1 = arith.constant 0 : i32
    %c0_i32_2 = arith.constant 0 : i32
    return %c0_i32, %c0_i32_0, %c0_i32_1 : i32, i32, i32
  }
  func.func @transform_6(%arg0: i32) -> (i32, i32) {
    %c0_i32 = arith.constant 0 : i32
    %c0_i32_0 = arith.constant 0 : i32
    %c0_i32_1 = arith.constant 0 : i32
    return %c0_i32, %c0_i32_0 : i32, i32
  }
  func.func @transform_7(%arg0: i32) -> (i32, i32) {
    %c0_i32 = arith.constant 0 : i32
    %c0_i32_0 = arith.constant 0 : i32
    %c0_i32_1 = arith.constant 0 : i32
    return %c0_i32, %c0_i32_0 : i32, i32
  }
  func.func @transform_8(%arg0: i32) -> (i32, i32) {
    %c0_i32 = arith.constant 0 : i32
    %c0_i32_0 = arith.constant 0 : i32
    %c0_i32_1 = arith.constant 0 : i32
    return %c0_i32, %c0_i32_0 : i32, i32
  }
  func.func @transform_9(%arg0: i32) -> (i32, i32) {
    %c0_i32 = arith.constant 0 : i32
    %c0_i32_0 = arith.constant 0 : i32
    %c0_i32_1 = arith.constant 0 : i32
    return %c0_i32, %c0_i32_0 : i32, i32
  }
  func.func @transform_10(%arg0: i32) -> (i32, i32) {
    %c0_i32 = arith.constant 0 : i32
    %c0_i32_0 = arith.constant 0 : i32
    %c0_i32_1 = arith.constant 0 : i32
    return %c0_i32, %c0_i32_0 : i32, i32
  }
  func.func @transform_11(%arg0: i32) -> (i32, i32) {
    %c0_i32 = arith.constant 0 : i32
    %c0_i32_0 = arith.constant 0 : i32
    %c0_i32_1 = arith.constant 0 : i32
    return %c0_i32, %c0_i32_0 : i32, i32
  }
  func.func @transform_12(%arg0: i32) -> (i32, i32) {
    %c0_i32 = arith.constant 0 : i32
    %c0_i32_0 = arith.constant 0 : i32
    %c0_i32_1 = arith.constant 0 : i32
    return %c0_i32, %c0_i32_0 : i32, i32
  }
  func.func @transform_13(%arg0: i32) -> (i32, i32, i32) {
    %c0_i32 = arith.constant 0 : i32
    %c0_i32_0 = arith.constant 0 : i32
    %c0_i32_1 = arith.constant 0 : i32
    return %arg0, %c0_i32, %c0_i32_0 : i32, i32, i32
  }
}

</mosaic_0001>

<bundles_post_ra>
// kernel: tpu_custom_call.1
= control target key start
LH: loop header
LB: loop body
LE: loop exit
PB: predicated region body
PF: predicated region fallthrough
CT: control target
= control target key end

     0   :  { %s1731_s0 = inlined_call_operand.vmem [shape: f32[2,8,32], index: 0, kind: input, shape index: {}]   ;;  %s1732_s1 = inlined_call_operand.hbm [shape: f32[1,32], index: 1, kind: input, shape index: {}]   ;;  %s1733_s2 = inlined_call_operand.vmem [shape: f32[1,32], index: 2, kind: input, shape index: {}]   ;;  %s1734_s3 = inlined_call_operand.vmem [shape: bf16[32,96], index: 3, kind: input, shape index: {}]   ;;  %s1735_s4 = inlined_call_operand.vmem [shape: f32[1,96], index: 4, kind: input, shape index: {}]   ;;  %s1736_s5 = inlined_call_operand.vmem [shape: bf16[4,8,32], index: 5, kind: input, shape index: {}]   ;;  %s1737_s6 = inlined_call_operand.vmem [shape: f32[1,32], index: 6, kind: input, shape index: {}]   ;;  %s1738_s7 = inlined_call_operand.vmem [shape: f32[1,32], index: 7, kind: input, shape index: {}]   ;;  %s1739_s8 = inlined_call_operand.vmem [shape: f32[1,32], index: 8, kind: input, shape index: {}]   ;;  %s1740_s9 = inlined_call_operand.hbm [shape: bf16[32,64], index: 9, kind: input, shape index: {}]   ;;  %s1741_s10 = inlined_call_operand.vmem [shape: f32[1,64], index: 10, kind: input, shape index: {}]   ;;  %s1742_s11 = inlined_call_operand.vmem [shape: bf16[64,32], index: 11, kind: input, shape index: {}]   ;;  %s1743_s12 = inlined_call_operand.vmem [shape: f32[1,32], index: 12, kind: input, shape index: {}]   ;;  %s1744_s13 = inlined_call_operand.hbm [shape: f32[2,8,32], index: 13, kind: output, shape index: {}]  }
   0x1   :  { %1748 = sst [smem:[#allocation14_spill]] %s1731_s0 }
   0x2   :  { %18 = vsyncpa [#allocation3], 0 }
   0x3   :  { %19 = vsyncpa [#allocation6], 0 }
   0x4   :  { %20 = vsyncpa [#allocation4], 0 }
   0x5   :  { %22 = vsyncpa [#allocation4 + $0x1], 0  ;;  %s1500_s25 = smov 0   ;;  %s1502_s26 = smov 0  }
   0x6   :  { %s1504_s27 = smov 0   ;;  %s1506_s28 = smov 0  }
   0x7 LB: > { %1749 = sst [smem:[#allocation11_spill]] %s1408_s27  ;;  %s1521_s29 = sadd.s32 4294967295, %s1412_s28   ;;  %s1412_s28 = sphi %s1506_s28, %s1756_s28   ;;  %s1408_s27 = sphi %s1504_s27, %s1758_s27   ;;  %s1404_s26 = sphi %s1502_s26, %s1760_s26   ;;  %s1400_s25 = sphi %s1500_s25, %s1759_s25  }
   0x8   : > { %s1102_s30 = sadd.s32 4294967294, %s1412_s28   ;;  %s1525_s14 = sadd.s32 1, %s1412_s28  }
   0x9   : > { %1750 = sst [smem:[#allocation12_spill]] %s1525_s14  ;;  %s313_s15 = sadd.s32 1, %s1408_s27 }
   0xa   : > { %s310_s16 = ssub.s32 %s1412_s28, %s1525_s14  ;;  %p323_p0 = scmp.ne.s32.totalorder %s1408_s27, %s1404_s26 }
   0xb   : > { %p311_p1 = scmp.eq.s32.totalorder %s310_s16, 0  ;;  %p324_p2 = scmp.eq.s32.totalorder %s1521_s29, 1 }
   0xc   : > { %p329_p3 = scmp.ne.s32.totalorder %s1404_s26, %s1400_s25  ;;  %p330_p4 = scmp.eq.s32.totalorder %s1102_s30, 1 }
   0xd   : > { %s1536_s17 = scalar_select %p311_p1, %s1408_s27, %s313_s15  }
   0xe   : > { %p1538_p5 = por %p324_p2, %p323_p0  ;;  %p1542_p6 = por %p330_p4, %p329_p3 }
   0xf   : > { %1751 = sst [smem:[#allocation13_spill]] %s1536_s17  ;;  %p1103_p7 = scmp.ge.s32.totalorder %s1412_s28, 1 }
  0x10   : > { %p337_p8 = scmp.lt.s32.totalorder %s1412_s28, 3  ;;  %p1195_p9 = scmp.eq.s32.totalorder %s1521_s29, 0 }
  0x11   : > { %s349_s23 = sshll.u32 %s1732_s1, 4  ;;  %s1414_s24 = smov [#allocation2]   ;;  %s350_s23 = int_to_ptr.hbm [resolvable:$true] %s349_s23 }
  0x12   : > { %p1549_p10 = pnand %p1103_p7, %p337_p8  ;;  %s351_s30 = sshll.u32 %s1414_s24, 4  ;;  %s352_s30 = int_to_ptr.vmem [resolvable:$true] %s351_s30 }
  0x13   : > { %s381_s17 = sshll.u32 %s1740_s9, 4  ;;  %s1415_s27 = smov [#allocation5]   ;;  %s382_s17 = int_to_ptr.hbm [resolvable:$true] %s381_s17 }
  0x14   : > { %p1184_p11 = pneg %p1549_p10  ;;  %s383_s14 = sshll.u32 %s1415_s27, 4  ;;  %s384_s14 = int_to_ptr.vmem [resolvable:$true] %s383_s14 }
  0x15   : > { %s1416_s21 = smov 64   ;;  %s1417_s22 = smov 4  }
  0x16   : > { %p1185_p12 = pnand %p1195_p9, %p1184_p11  ;;  %415 = sbr.rel (%p1549_p10) target bundleno = 2308 (0x904), region = 72 }
  0x18   : > { %1187 = dma.hbm_to_vmem [thread:$0]  (!%p1185_p12), %s350_s23, 16, %s352_s30, [#allocation3]  }
  0x19   : > { %1190 = dma.hbm_to_vmem [thread:$0]  (!%p1185_p12), %s382_s17, 256, %s384_s14, [#allocation6], %s1416_s21, %s1416_s21, %s1417_s22  }
  0x1b   : > { %1387 = dma.done.wait (%p1195_p9), [#allocation3], 16  }
  0x1c   : > { %1389 = vsyncadd (%p1195_p9), [#allocation3], 4294967280 }
  0x1d   : > { %1391 = dma.done.wait (%p1195_p9), [#allocation6], 256  }
  0x1e   : > { %1393 = vsyncadd (%p1195_p9), [#allocation6], 4294967040  ;;  %p464_p13 = scmp.lt.s32.totalorder %s1521_s29, 1  ;;  %s1755_s0 = sld [smem:[#allocation14_spill]]  ;;  %vm470_vm0 = vcmask 261120   ;;  %v1418_v2 = vmov 32.0  }
  0x1f   : > { %1256 = vrcp.f32 %v1418_v2  ;;  %v1167_v14 = vld [vmem:[%s1734_s3 + $0x8] sm:$0xff]  ;;  %v1166_v15 = vld [vmem:[%s1734_s3] sm:$0xff]  ;;  %s1419_s17 = smov 88   ;;  %s1420_s20 = smov 96   ;;  %vm554_vm4 = vcmask 64512   ;;  %vm592_vm5 = vcmask 1043456  }
  0x20   : > { %s465_s27 = scalar_select %p464_p13, %s1521_s29, 1  ;;  %543 = vmatpush.bf16.msra.mxu0 %v1167_v14  ;;  %v1248_v29 = vld [vmem:[#allocation2] ss:$0 sm:$0xff]  ;;  %vm981_vm8 = vcmask 523264  }
  0x21   : > { %v1249_v32 = vld [vmem:[%s1733_s2] ss:$0 sm:$0xff]  ;;  %s1422_s24 = smov 112   ;;  %s1423_s30 = smov 64  }
  0x22   : > { %s1111_s14 = sshll.u32 %s465_s27, 3  ;;  %v1250_v36 = vld [vmem:[%s1735_s4] ss:$0 sm:$0xff]  ;;  %s1424_s15 = smov 120  }
  0x23   : > { %s1425_s16 = smov 72   ;;  %s1426_s21 = smov 104   ;;  %v610_v56 = vld [vmem:[%s1736_s5] sm:$0xf] }
  0x24   : > { %s467_s23 = scalar_lea.vmem %s1755_s0, %s1111_s14  ;;  %544 = vmatpush.bf16.msra.mxu0 %v1166_v15  ;;  %v694_v57 = vsel %vm592_vm5, %v610_v56, 0  ;;  %s1427_s14 = smov 40   ;;  %v1130_v56 = vld [vmem:[%s1736_s5 + $0x8] sm:$0xf] }
  0x25   : > { %v1578_v0 = vld [vmem:[%s467_s23] sm:$0xff]  ;;  %v1257_v3 = vpop.eup %1256  ;;  %s1421_s23 = smov 80  }
  0x26   : > { %v471_v1 = vsel %vm470_vm0, %v1578_v0, 0.0  ;;  %v475_v4 = vmul.f32 32.0, %v1257_v3  ;;  %vm479_vm1 = vweird.f32 %v1257_v3 }
  0x27   : > { %472 = vadd.xlane.f32.xlu0 %v471_v1 }
  0x28   : > { %v476_v5 = vsub.f32 1.0, %v475_v4 }
  0x2a   : > { %v477_v6 = vmul.f32 %v1257_v3, %v476_v5 }
  0x2c   : > { %v478_v7 = vadd.f32 %v1257_v3, %v477_v6 }
  0x2e   : > { %v1582_v8 = vsel %vm479_vm1, %v1257_v3, %v478_v7 }
  0x9a   : > { %v473_v9 = vpop.xlane.xlu0 %472 }
  0x9b   : > { %v481_v10 = vmul.f32 %v1582_v8, %v473_v9 }
  0x9d   : > { %v482_v11 = vsub.f32 %v1578_v0, %v481_v10 }
  0x9f   : > { %v483_v12 = vmul.f32 %v482_v11, %v482_v11 }
  0xa1   : > { %v484_v13 = vsel %vm470_vm0, %v483_v12, 0.0 }
  0xa2   : > { %485 = vadd.xlane.f32.xlu0 %v484_v13 }
 0x115   : > { %v486_v16 = vpop.xlane.xlu0 %485 }
 0x116   : > { %v487_v17 = vmul.f32 0.032258064, %v486_v16 }
 0x118   : > { %1258 = vrsqrt.f32 %v487_v17  ;;  %vm495_vm2 = vcmp.eq.f32.partialorder %v487_v17, inf  ;;  %v498_v25 = vand.u32 2147483648, %v487_v17  ;;  %vm497_vm3 = vcmp.eq.f32.partialorder %v487_v17, 0.0 }
 0x11e   : > { %v1259_v18 = vpop.eup %1258 }
 0x11f   : > { %v489_v19 = vmul.f32 %v1259_v18, %v487_v17 }
 0x121   : > { %v490_v20 = vmul.f32 %v1259_v18, %v489_v19 }
 0x123   : > { %v491_v21 = vmul.f32 0.5, %v490_v20 }
 0x125   : > { %v492_v22 = vsub.f32 1.5, %v491_v21 }
 0x127   : > { %v493_v23 = vmul.f32 %v1259_v18, %v492_v22 }
 0x129   : > { %v494_v24 = vmul.f32 %v493_v23, %v487_v17 }
 0x12b   : > { %v496_v26 = vsel %vm495_vm2, %v487_v17, %v494_v24 }
 0x12c   : > { %v499_v27 = vsel %vm497_vm3, %v498_v25, %v496_v26 }
 0x12d   : > { %v500_v28 = vadd.f32 1e-06, %v499_v27 }
 0x12f   : > { %1260 = vrcp.f32 %v500_v28 }
 0x135   : > { %v1261_v30 = vpop.eup %1260 }
 0x136   : > { %v503_v31 = vmul.f32 %v1261_v30, %v482_v11 }
 0x138   : > { %v507_v33 = vmul.f32 %v1248_v29, %v503_v31 }
 0x13a   : > { %v512_v34 = vadd.f32 %v1249_v32, %v507_v33 }
 0x13c   : > { %v513_v35 = vpack.c.bf16 %v512_v34, %v512_v34 }
 0x13e   : > { %1120 = vmatmul.msk.bf16.vlgmr.msra.gmra.mxu0 %vm470_vm0, %v513_v35 }
 0x1bb   : > { %v546_v37 = vpop.f32.mrf.mxu0 }
 0x1bc   : > { %v547_v38 = vadd.f32 %v1250_v36, %v546_v37 }
 0x1be   : > { %v1600_v39 = vpack.c.bf16 %v547_v38, %v547_v38 }
 0x1c0   : > { %613 = vrot.lane.b32.xlu0 %v1600_v39, %s1419_s17  ;;  %552 = vrot.lane.b32.xlu1 %v1600_v39, %s1420_s20  ;;  %s1428_s17 = smov 56   ;;  %s1429_s20 = smov 48  }
 0x1c3   : > { %v548_v40 = vpop.f32.mrf.mxu0 }
 0x1c8   : > { %711 = vrot.lane.b32.xlu0 %v1600_v39, %s1421_s23  ;;  %s461_s23 = sand.u32 1, %s1404_s26  }
 0x1d0   : > { %709 = vrot.lane.b32.xlu0 %v1600_v39, %s1422_s24  ;;  %s1110_s24 = sshll.u32 %s461_s23, 3 }
 0x232   : > { %v614_v41 = vpop.permute.xlu0 %613  ;;  %v553_v42 = vpop.permute.xlu1 %552 }
 0x233   : > { %v559_v43 = vsel %vm554_vm4, %v553_v42, 0  ;;  %v619_v44 = vsel %vm554_vm4, %v614_v41, 0 }
 0x234   : > { %568 = vmatpush.bf16.xpose.msra.mxu1 %v559_v43  ;;  %628 = vmatpush.bf16.xpose.msra.mxu3 %v619_v44 }
 0x23a   : > { %v712_v45 = vpop.permute.xlu0 %711 }
 0x23b   : > { %1121 = vmatmul.msk.bf16.vlgmr.msra.gmra.mxu1 %vm554_vm4, %v1600_v39  ;;  %v717_v46 = vsel %vm554_vm4, %v712_v45, 0 }
 0x23c   : > { %726 = vmatpush.bf16.xpose.msrb.mxu3 %v717_v46  ;;  %703 = vmatpush.bf16.msrb.mxu1 %v694_v57  ;;  %v773_v57 = vsel %vm592_vm5, %v1130_v56, 0 }
 0x242   : > { %v710_v4 = vpop.permute.xlu0 %709 }
 0x2b8   : > { %v570_v47 = vpop.f32.mrf.mxu1 }
 0x2b9   : > { %v574_v48 = vmul.f32 0.35355338, %v570_v47 }
 0x2bb   : > { %v575_v49 = vsel %vm554_vm4, %v574_v48, -inf }
 0x2bc   : > { %576 = vmax.xlane.f32.xlu1 %v575_v49 }
 0x2c0   : > { %v572_v50 = vpop.f32.mrf.mxu1 }
 0x32f   : > { %v577_v51 = vpop.xlane.xlu1 %576 }
 0x330   : > { %v578_v52 = vsub.f32 %v574_v48, %v577_v51 }
 0x332   : > { %v579_v53 = vmul.f32 1.442695, %v578_v52 }
 0x334   : > { %1262 = vpow2.f32 %v579_v53  ;;  %v1125_v53 = vld [vmem:[%s1736_s5 + $0x4] sm:$0xf] }
 0x33a   : > { %v1263_v54 = vpop.eup %1262 }
 0x33b   : > { %v581_v55 = vsel %vm554_vm4, %v1263_v54, 0.0 }
 0x33c   : > { %582 = vadd.xlane.f32.xlu2 %v581_v55 }
 0x354   : > { %587 = vrot.lane.b32.xlu2 %v1600_v39, %s1423_s30  ;;  %s1163_s30 = sshll.u32 %s1521_s29, 3  ;;  %s1006_s29 = scalar_lea.sflag [#allocation4], %s461_s23 }
 0x35c   : > { %611 = vrot.lane.b32.xlu2 %v1600_v39, %s1424_s15 }
 0x364   : > { %791 = vrot.lane.b32.xlu2 %v1600_v39, %s1425_s16 }
 0x36c   : > { %789 = vrot.lane.b32.xlu2 %v1600_v39, %s1426_s21  ;;  %s1016_s21 = scalar_lea.hbm %s1744_s13, %s1163_s30 }
 0x3af   : > { %v583_v58 = vpop.xlane.xlu2 %582 }
 0x3b0   : > { %1264 = vrcp.f32 %v583_v58 }
 0x3b6   : > { %v1265_v59 = vpop.eup %1264 }
 0x3b7   : > { %v588_v60 = vpop.permute.xlu2 %587  ;;  %v585_v61 = vmul.f32 %v1265_v59, %v1263_v54  ;;  %v675_v54 = vsel %vm592_vm5, %v1125_v53, 0 }
 0x3b8   : > { %v594_v62 = vsel %vm592_vm5, %v588_v60, 0  ;;  %684 = vmatpush.bf16.msrb.mxu0 %v675_v54 }
 0x3b9   : > { %603 = vmatpush.bf16.msra.mxu2 %v594_v62  ;;  %v586_v63 = vpack.c.bf16 %v585_v61, %v585_v61  ;;  %v1134_v61 = vld [vmem:[%s1736_s5 + $0xc] sm:$0xf] }
 0x3ba   : > { %v853_v62 = vsel %vm592_vm5, %v1134_v61, 0 }
 0x3bc   : > { %1122 = vmatmul.msk.bf16.vlgmr.msra.gmra.mxu2 %vm554_vm4, %v586_v63  ;;  %782 = vmatpush.bf16.msra.mxu0 %v773_v57 }
 0x3bf   : > { %v612_v1 = vpop.permute.xlu2 %611 }
 0x3c0   : > { %1123 = vmatmul.msk.bf16.vlgmr.msra.gmra.mxu3 %vm554_vm4, %v612_v1 }
 0x3c7   : > { %v792_v2 = vpop.permute.xlu2 %791 }
 0x3c8   : > { %v797_v3 = vsel %vm554_vm4, %v792_v2, 0 }
 0x3c9   : > { %806 = vmatpush.bf16.xpose.msra.mxu1 %v797_v3 }
 0x3cf   : > { %v790_v13 = vpop.permute.xlu2 %789 }
 0x3d0   : > { %1128 = vmatmul.msk.bf16.vlgmr.msrb.gmra.mxu3 %vm554_vm4, %v710_v4 }
 0x43f   : > { %v605_v5 = vpop.f32.mrf.mxu2 }
 0x440   : > { %v609_v6 = vpack.c.bf16 %v605_v5, %v605_v5 }
 0x442   : > { %1127 = vmatmul.msk.bf16.vlgmr.msrb.gmra.mxu1 %vm554_vm4, %v609_v6 }
 0x443   : > { %v630_v7 = vpop.f32.mrf.mxu3 }
 0x444   : > { %v634_v9 = vmul.f32 0.35355338, %v630_v7 }
 0x446   : > { %v635_v10 = vsel %vm554_vm4, %v634_v9, -inf }
 0x447   : > { %v607_v11 = vpop.f32.mrf.mxu2  ;;  %636 = vmax.xlane.f32.xlu1 %v635_v10 }
 0x44b   : > { %v632_v12 = vpop.f32.mrf.mxu3 }
 0x452   : > { %1132 = vmatmul.msk.bf16.vlgmr.msra.gmra.mxu1 %vm554_vm4, %v790_v13 }
 0x453   : > { %v728_v14 = vpop.f32.mrf.mxu3 }
 0x454   : > { %v732_v15 = vmul.f32 0.35355338, %v728_v14 }
 0x456   : > { %v733_v16 = vsel %vm554_vm4, %v732_v15, -inf }
 0x457   : > { %734 = vmax.xlane.f32.xlu2 %v733_v16 }
 0x45b   : > { %v730_v17 = vpop.f32.mrf.mxu3 }
 0x46f   : > { %825 = vrot.lane.b32.xlu2 %v1600_v39, %s1427_s14  ;;  %s463_s14 = scalar_lea.vmem [#allocation7], %s1110_s24  ;;  %s1362_s24 = scalar_lea.hbm %s1744_s13, 16 }
 0x4ba   : > { %v637_v18 = vpop.xlane.xlu1 %636 }
 0x4bb   : > { %v638_v19 = vsub.f32 %v634_v9, %v637_v18  ;;  %v1251_v18 = vld [vmem:[%s1737_s6] ss:$0 sm:$0xff] }
 0x4bd   : > { %v639_v20 = vmul.f32 1.442695, %v638_v19 }
 0x4bf   : > { %1266 = vpow2.f32 %v639_v20  ;;  %v1631_v21 = vpop.f32.mrf.mxu1 }
 0x4c5   : > { %v1267_v22 = vpop.eup %1266 }
 0x4c6   : > { %v641_v23 = vsel %vm554_vm4, %v1267_v22, 0.0 }
 0x4c7   : > { %642 = vadd.xlane.f32.xlu1 %v641_v23  ;;  %v707_v24 = vpop.f32.mrf.mxu1 }
 0x4ca   : > { %v735_v25 = vpop.xlane.xlu2 %734 }
 0x4cb   : > { %v736_v26 = vsub.f32 %v732_v15, %v735_v25 }
 0x4cd   : > { %v737_v27 = vmul.f32 1.442695, %v736_v26 }
 0x4cf   : > { %v808_v28 = vpop.f32.mrf.mxu1  ;;  %1268 = vpow2.f32 %v737_v27 }
 0x4d0   : > { %v812_v29 = vmul.f32 0.35355338, %v808_v28  ;;  %v1169_v28 = vld [vmem:[#allocation5 + $0x8] sm:$0xff] }
 0x4d2   : > { %v826_v30 = vpop.permute.xlu2 %825  ;;  %v813_v31 = vsel %vm554_vm4, %v812_v29, -inf }
 0x4d3   : > { %v831_v32 = vsel %vm592_vm5, %v826_v30, 0  ;;  %814 = vmax.xlane.f32.xlu0 %v813_v31 }
 0x4d4   : > { %840 = vmatpush.bf16.msra.mxu3 %v831_v32  ;;  %v1173_v32 = vld [vmem:[%s1742_s11 + $0x18] sm:$0xff] }
 0x4d5   : > { %v1269_v33 = vpop.eup %1268  ;;  %989 = vmatpush.bf16.msrb.mxu1 %v1173_v32 }
 0x4d6   : > { %v739_v35 = vsel %vm554_vm4, %v1269_v33, 0.0 }
 0x4d7   : > { %v810_v34 = vpop.f32.mrf.mxu1 }
 0x4db   : > { %740 = vadd.xlane.f32.xlu0 %v739_v35 }
 0x4e0   : > { %647 = vrot.lane.b32.xlu1 %v1600_v39, %s1428_s17  ;;  %s1018_s17 = sshll.u32 %s463_s14, 4  ;;  %s1019_s17 = int_to_ptr.vmem [resolvable:$true] %s1018_s17 }
 0x4ef   : > { %745 = vrot.lane.b32.xlu0 %v1600_v39, %s1429_s20  ;;  %s1020_s20 = sshll.u32 %s1016_s21, 4  ;;  %s1021_s20 = int_to_ptr.hbm [resolvable:$true] %s1020_s20 }
 0x4f0   : > { %s1356_s0 = sshra.s32 %s1021_s20, 4  ;;  %s1357_s0 = int_to_ptr.hbm [resolvable:$true] %s1356_s0 }
 0x4f1   : > { %s1358_s30 = scalar_lea.hbm %s1357_s0, 8  ;;  %p1363_p3 = scmp.lt.s32.totalorder %s1357_s0, %s1744_s13 }
 0x4f2   : > { %p1359_p0 = scmp.ne.s32.totalorder %s1357_s0, %s1358_s30  ;;  %p1364_p4 = scmp.lt.s32.totalorder %s1362_s24, %s1358_s30 }
 0x4f4   : > { %p1360_p1 = pnand %p1359_p0, %p1538_p5  ;;  %p1365_p7 = por %p1364_p4, %p1363_p3 }
 0x4f6   : > { %p1361_p2 = pneg %p1360_p1 }
 0x4f8   : > { %p1366_p8 = pnand %p1365_p7, %p1361_p2 }
 0x53a   : > { %v643_v36 = vpop.xlane.xlu1 %642 }
 0x53b   : > { %1270 = vrcp.f32 %v643_v36  ;;  %v1171_v36 = vld [vmem:[%s1742_s11 + $0x8] sm:$0xff] }
 0x541   : > { %v1271_v41 = vpop.eup %1270 }
 0x542   : > { %v645_v43 = vmul.f32 %v1271_v41, %v1267_v22 }
 0x544   : > { %v646_v48 = vpack.c.bf16 %v645_v43, %v645_v43 }
 0x546   : > { %v815_v37 = vpop.xlane.xlu0 %814 }
 0x547   : > { %v816_v38 = vsub.f32 %v812_v29, %v815_v37  ;;  %v1168_v29 = vld [vmem:[#allocation5] sm:$0xff] }
 0x549   : > { %v817_v40 = vmul.f32 1.442695, %v816_v38 }
 0x54b   : > { %1272 = vpow2.f32 %v817_v40 }
 0x54e   : > { %v741_v47 = vpop.xlane.xlu0 %740 }
 0x54f   : > { %1274 = vrcp.f32 %v741_v47 }
 0x551   : > { %v1273_v42 = vpop.eup %1272 }
 0x552   : > { %v648_v44 = vpop.permute.xlu1 %647  ;;  %v819_v45 = vsel %vm554_vm4, %v1273_v42, 0.0 }
 0x553   : > { %820 = vadd.xlane.f32.xlu1 %v819_v45  ;;  %v653_v46 = vsel %vm592_vm5, %v648_v44, 0  ;;  %v1252_v45 = vld [vmem:[%s1738_s7] ss:$0 sm:$0xff] }
 0x554   : > { %662 = vmatpush.bf16.msrb.mxu2 %v653_v46 }
 0x555   : > { %v1275_v39 = vpop.eup %1274 }
 0x556   : > { %v743_v49 = vmul.f32 %v1275_v39, %v1269_v33 }
 0x557   : > { %1124 = vmatmul.msk.bf16.vlgmr.msrb.gmra.mxu2 %vm554_vm4, %v646_v48  ;;  %v1253_v48 = vld [vmem:[%s1739_s8] ss:$0 sm:$0xff] }
 0x558   : > { %v744_v52 = vpack.c.bf16 %v743_v49, %v743_v49 }
 0x561   : > { %v746_v50 = vpop.permute.xlu0 %745 }
 0x562   : > { %v751_v51 = vsel %vm592_vm5, %v746_v50, 0 }
 0x563   : > { %760 = vmatpush.bf16.msra.mxu2 %v751_v51  ;;  %v1170_v51 = vld [vmem:[%s1742_s11] sm:$0xff] }
 0x567   : > { %1129 = vmatmul.msk.bf16.vlgmr.msra.gmra.mxu2 %vm554_vm4, %v744_v52  ;;  %v1254_v52 = vld [vmem:[%s1741_s10] ss:$0 sm:$0xff] }
 0x568   : > { %862 = vmatpush.bf16.msrb.mxu2 %v853_v62 }
 0x5c6   : > { %v821_v55 = vpop.xlane.xlu1 %820 }
 0x5c7   : > { %1276 = vrcp.f32 %v821_v55 }
 0x5cd   : > { %v1277_v58 = vpop.eup %1276 }
 0x5ce   : > { %v823_v59 = vmul.f32 %v1277_v58, %v1273_v42  ;;  %v1255_v58 = vld [vmem:[%s1743_s12] ss:$0 sm:$0xff] }
 0x5d0   : > { %v824_v60 = vpack.c.bf16 %v823_v59, %v823_v59 }
 0x5d2   : > { %1133 = vmatmul.msk.bf16.vlgmr.msra.gmra.mxu3 %vm554_vm4, %v824_v60 }
 0x5da   : > { %v664_v63 = vpop.f32.mrf.mxu2 }
 0x5db   : > { %v668_v1 = vpack.c.bf16 %v664_v63, %v664_v63 }
 0x5dd   : > { %1126 = vmatmul.msk.bf16.vlgmr.msrb.gmra.mxu0 %vm554_vm4, %v668_v1 }
 0x5de   : > { %940 = vmatpush.bf16.msrb.mxu0 %v1169_v28 }
 0x5e2   : > { %v666_v2 = vpop.f32.mrf.mxu2  ;;  %941 = vmatpush.bf16.msrb.mxu0 %v1168_v29 }
 0x5ea   : > { %v762_v3 = vpop.f32.mrf.mxu2 }
 0x5eb   : > { %v766_v4 = vpack.c.bf16 %v762_v3, %v762_v3 }
 0x5ed   : > { %1131 = vmatmul.msk.bf16.vlgmr.msra.gmra.mxu0 %vm554_vm4, %v766_v4 }
 0x5f2   : > { %v764_v5 = vpop.f32.mrf.mxu2 }
 0x655   : > { %v842_v6 = vpop.f32.mrf.mxu3 }
 0x656   : > { %v846_v7 = vpack.c.bf16 %v842_v6, %v842_v6 }
 0x658   : > { %1135 = vmatmul.msk.bf16.vlgmr.msrb.gmra.mxu2 %vm554_vm4, %v846_v7 }
 0x65a   : > { %v686_v9 = vpop.f32.mrf.mxu0 }
 0x65b   : > { %v706_v12 = vadd.f32 %v1631_v21, %v686_v9 }
 0x65d   : > { %v844_v10 = vpop.f32.mrf.mxu3 }
 0x662   : > { %v688_v11 = vpop.f32.mrf.mxu0 }
 0x66a   : > { %v784_v13 = vpop.f32.mrf.mxu0 }
 0x66b   : > { %v788_v14 = vadd.f32 %v784_v13, %v706_v12 }
 0x672   : > { %v786_v15 = vpop.f32.mrf.mxu0 }
 0x6db   : > { %v864_v16 = vpop.f32.mrf.mxu2 }
 0x6dc   : > { %v868_v17 = vadd.f32 %v864_v16, %v788_v14 }
 0x6de   : > { %v869_v19 = vadd.f32 %v868_v17, %v1578_v0 }
 0x6e0   : > { %v1665_v20 = vadd.f32 %v1251_v18, %v869_v19 }
 0x6e2   : > { %v875_v22 = vsel %vm470_vm0, %v1665_v20, 0.0 }
 0x6e3   : > { %v866_v23 = vpop.f32.mrf.mxu2  ;;  %876 = vadd.xlane.f32.xlu2 %v875_v22 }
 0x756   : > { %v877_v24 = vpop.xlane.xlu2 %876 }
 0x757   : > { %v878_v21 = vmul.f32 %v877_v24, %v1582_v8  ;;  %v1172_v8 = vld [vmem:[%s1742_s11 + $0x10] sm:$0xff] }
 0x758   : > { %990 = vmatpush.bf16.msrb.mxu1 %v1172_v8 }
 0x759   : > { %v879_v25 = vsub.f32 %v1665_v20, %v878_v21 }
 0x75b   : > { %v880_v26 = vmul.f32 %v879_v25, %v879_v25 }
 0x75c   : > { %991 = vmatpush.bf16.msrb.mxu1 %v1171_v36 }
 0x75d   : > { %v881_v27 = vsel %vm470_vm0, %v880_v26, 0.0 }
 0x75e   : > { %882 = vadd.xlane.f32.xlu0 %v881_v27 }
 0x760   : > { %992 = vmatpush.bf16.msrb.mxu1 %v1170_v51 }
 0x7d1   : > { %v883_v0 = vpop.xlane.xlu0 %882 }
 0x7d2   : > { %v884_v30 = vmul.f32 0.032258064, %v883_v0 }
 0x7d4   : > { %1278 = vrsqrt.f32 %v884_v30  ;;  %vm892_vm6 = vcmp.eq.f32.partialorder %v884_v30, inf  ;;  %v895_v41 = vand.u32 2147483648, %v884_v30  ;;  %vm894_vm7 = vcmp.eq.f32.partialorder %v884_v30, 0.0 }
 0x7da   : > { %v1279_v31 = vpop.eup %1278 }
 0x7db   : > { %v886_v33 = vmul.f32 %v1279_v31, %v884_v30 }
 0x7dd   : > { %v887_v34 = vmul.f32 %v1279_v31, %v886_v33 }
 0x7df   : > { %v888_v35 = vmul.f32 0.5, %v887_v34 }
 0x7e1   : > { %v889_v37 = vsub.f32 1.5, %v888_v35 }
 0x7e3   : > { %v890_v38 = vmul.f32 %v1279_v31, %v889_v37 }
 0x7e5   : > { %v891_v40 = vmul.f32 %v890_v38, %v884_v30 }
 0x7e7   : > { %v893_v42 = vsel %vm892_vm6, %v884_v30, %v891_v40 }
 0x7e8   : > { %v896_v43 = vsel %vm894_vm7, %v895_v41, %v893_v42 }
 0x7e9   : > { %v897_v44 = vadd.f32 1e-06, %v896_v43 }
 0x7eb   : > { %1280 = vrcp.f32 %v897_v44 }
 0x7f1   : > { %v1281_v46 = vpop.eup %1280 }
 0x7f2   : > { %v900_v47 = vmul.f32 %v1281_v46, %v879_v25 }
 0x7f4   : > { %v904_v39 = vmul.f32 %v1252_v45, %v900_v47 }
 0x7f6   : > { %v909_v49 = vadd.f32 %v1253_v48, %v904_v39 }
 0x7f8   : > { %v910_v50 = vpack.c.bf16 %v909_v49, %v909_v49 }
 0x7fa   : > { %1144 = vmatmul.msk.bf16.vlgmr.msrb.gmra.mxu0 %vm470_vm0, %v910_v50 }
 0x877   : > { %v943_v53 = vpop.f32.mrf.mxu0 }
 0x878   : > { %v944_v54 = vadd.f32 %v1254_v52, %v943_v53 }
 0x87a   : > { %v947_v55 = vmax.f32 %v944_v54, 0.0 }
 0x87c   : > { %v948_v56 = vpack.c.bf16 %v947_v55, %v947_v55 }
 0x87e   : > { %1161 = vmatmul.msk.bf16.vlgmr.msrb.gmra.mxu1 %vm981_vm8, %v948_v56 }
 0x87f   : > { %v945_v57 = vpop.f32.mrf.mxu0 }
 0x8fb   : > { %v994_v59 = vpop.f32.mrf.mxu1 }
 0x8fc   : > { %v998_v60 = vadd.f32 %v994_v59, %v1665_v20 }
 0x8fe   : > { %v1003_v61 = vadd.f32 %v1255_v58, %v998_v60 }
 0x900   : > { %1004 = vst.msk [vmem:[%s463_s14] sm:$0xff] %vm470_vm0, %v1003_v61 }
 0x901   : > { %1369 = shalt.err (!%p1366_p8)
}
 0x902   : > { %1182 = dma.vmem_to_hbm [thread:$0]  (%p1538_p5), %s1019_s17, 128, %s1021_s20, %s1006_s29  }
 0x903   : > { %v996_v62 = vpop.f32.mrf.mxu1 }
 0x904 PF: > { %p1199_p9 = scmp.ge.s32.totalorder %s1412_s28, 2  ;;  %s1032_s23 = sand.u32 1, %s1400_s25  }
 0x905   : > { %s1033_s27 = scalar_lea.sflag [#allocation4], %s1032_s23 }
 0x906   : > { %p1192_p10 = pnand %p1199_p9, %p1542_p6 }
 0x908   : > { %p1193_p11 = pneg %p1192_p10 }
 0x90a   : > { %1395 = dma.done.wait (%p1193_p11), %s1033_s27, 128  }
 0x90b   : > { %1397 = vsyncadd (%p1193_p11), %s1033_s27, 4294967168  ;;  %s1756_s28 = sld [smem:[#allocation12_spill]]  ;;  %s1759_s25 = smov %s1404_s26 }
 0x90c   : > { %s1757_s0 = sld [smem:[#allocation11_spill]] }
 0x90d   : > { %s1758_s27 = sld [smem:[#allocation13_spill]] }
 0x911   : > { %p25_p12 = scmp.ge.s32.totalorder %s1756_s28, 4  }
 0x912   : > { %s1760_s26 = smov %s1757_s0 }
 0x913   :  { %27 = sbr.rel (!%p25_p12) target bundleno = 7 (0x7), region = 119 }
 0x918   :  { %1039 = vsyncpa [#allocation3], 1 }
 0x919   :  { %1041 = vsyncpa [#allocation3 + $0x1], 1 }
 0x91a   :  { %1042 = vsyncpa [#allocation6], 1 }
 0x91b   :  { %1043 = vsyncpa [#allocation4], 1 }
 0x91c   :  { %1045 = vsyncpa [#allocation4 + $0x1], 1 }

</bundles_post_ra>
